<compile_context>
chip_gen: v5e
topology: v5e:2x2
jax: 0.10.0
libtpu: 0.0.40
codegen_flags: <defaults>
</compile_context>

<pallas_src>
import functools

import jax
import jax.numpy as jnp
from jax.experimental import pallas as pl
from jax.experimental.pallas import tpu as pltpu


MIN_LANE_TILE = 128


# --------------------------------------------------------------------------- #
# Small helpers
# --------------------------------------------------------------------------- #

def _ceil_div(a, b):
    return -(-a // b)


def _round_up(x, m):
    return _ceil_div(x, m) * m


def _vmem_budgets(budget_override=None):
    """Returns (tile-sizing budget, scoped-VMEM limit handed to Mosaic), bytes.

    Sized off the physical VMEM of the current generation (64 MiB on v7x,
    128 MiB on v5e/v6e) so the same code picks bigger blocks on older chips.
    """
    cap = 0
    try:
        info = pltpu.get_tpu_info()
        cap = int(getattr(info, "vmem_capacity_bytes", 0) or 0)
    except Exception:
        cap = 0
    if cap <= 0:
        cap = 64 * 1024 * 1024  # conservative fallback: v7x has the smallest VMEM
    limit = int(cap * 0.75)     # scoped-VMEM limit (leave compiler headroom)
    budget = int(cap * 0.55)    # what the tiles/blocks are sized against
    if budget_override is not None:
        budget = min(int(budget_override), budget)
    return budget, limit


def _plan_tiles(hw, target_tile):
    """Pick (tile, n_tiles, hw_pad): tile a multiple of 128, tile*n_tiles=hw_pad>=hw,
    padding waste < 128 lanes per tile."""
    hw_min = _round_up(hw, MIN_LANE_TILE)
    target = max(MIN_LANE_TILE, (int(target_tile) // MIN_LANE_TILE) * MIN_LANE_TILE)
    n_tiles = max(1, _ceil_div(hw_min, target))
    tile = _round_up(_ceil_div(hw_min, n_tiles), MIN_LANE_TILE)
    return tile, n_tiles, tile * n_tiles


def _fold_lanes(x, lanes=MIN_LANE_TILE):
    """(..., T) with T % lanes == 0 -> (..., lanes) partial sums.

    Pure 128-lane-aligned slices + VPU adds (one vadd per loaded vreg), so the
    steady-state reduction loop never touches the XLU; the single cross-lane
    reduce happens once, in the epilogue.
    """
    t = x.shape[-1]
    s = x[..., :lanes]
    for j in range(1, t // lanes):
        s = s + x[..., j * lanes:(j + 1) * lanes]
    return s


def _gate_columns(mean_v, mean_s, w_sq_v, w_sq_s, b_sq, w_gates, b_gates):
    """Squeeze/excite FCs + sigmoid in column form.

    Everything keeps channels / dim_out on the sublane axis, so the resulting
    (Cv+Cs, 1) gate column broadcasts over the lane (HW) axis with no relayout.
      exc   = relu(W_sq  @ mean_col + b_sq)        (dim_out, 1)
      gates = sigmoid(W_g @ exc      + b_g)        (Cv+Cs, 1)
    The two gate FCs (fc_visual / fc_skeleton) are fused into one MXU pass via
    the row-concatenated weight W_g.
    """
    exc = (jnp.dot(w_sq_v, mean_v, preferred_element_type=jnp.float32)
           + jnp.dot(w_sq_s, mean_s, preferred_element_type=jnp.float32)
           + b_sq)
    exc = jnp.maximum(exc, 0.0)  # ReLU
    return jax.nn.sigmoid(
        jnp.dot(w_gates, exc, preferred_element_type=jnp.float32) + b_gates)


# --------------------------------------------------------------------------- #
# Fused single-read path: one batch element per grid step, slab resident in VMEM
# --------------------------------------------------------------------------- #

def _fused_kernel(vis_ref, sk_ref,
                  w_sq_v_ref, w_sq_s_ref, b_sq_ref, w_gates_ref, b_gates_ref,
                  out_vis_ref, out_sk_ref,
                  *, cv, inv_hw):
    vis = vis_ref[...]                                     # (1, Cv, HWp)
    sk = sk_ref[...]                                       # (1, Cs, HWp)

    # Per-channel spatial means: VPU lane folds + one cross-lane reduce each.
    mean_v = jnp.sum(_fold_lanes(vis)[0], axis=-1, keepdims=True) * inv_hw  # (Cv, 1)
    mean_s = jnp.sum(_fold_lanes(sk)[0], axis=-1, keepdims=True) * inv_hw   # (Cs, 1)

    gates = _gate_columns(mean_v, mean_s,
                          w_sq_v_ref[...], w_sq_s_ref[...], b_sq_ref[...],
                          w_gates_ref[...], b_gates_ref[...])               # (Cv+Cs, 1)

    # Modulate the slab that is already resident in VMEM (single HBM read).
    out_vis_ref[...] = vis * gates[None, :cv, :]
    out_sk_ref[...] = sk * gates[None, cv:, :]


def _mmtm_fused(vis3, sk3, weights, *, cv, cs, dim_out, inv_hw, vmem_limit):
    B, _, hw_pad = vis3.shape
    w_sq_v, w_sq_s, b_sq, w_gates, b_gates = weights
    io_bytes = 4 * B * (cv + cs) * hw_pad

    return pl.pallas_call(
        functools.partial(_fused_kernel, cv=cv, inv_hw=inv_hw),
        out_shape=(jax.ShapeDtypeStruct((B, cv, hw_pad), jnp.float32),
                   jax.ShapeDtypeStruct((B, cs, hw_pad), jnp.float32)),
        grid_spec=pltpu.PrefetchScalarGridSpec(
            num_scalar_prefetch=0,
            grid=(B,),
            in_specs=[
                pl.BlockSpec((1, cv, hw_pad), lambda b: (b, 0, 0)),
                pl.BlockSpec((1, cs, hw_pad), lambda b: (b, 0, 0)),
                pl.BlockSpec((dim_out, cv), lambda b: (0, 0)),
                pl.BlockSpec((dim_out, cs), lambda b: (0, 0)),
                pl.BlockSpec((dim_out, 1), lambda b: (0, 0)),
                pl.BlockSpec((cv + cs, dim_out), lambda b: (0, 0)),
                pl.BlockSpec((cv + cs, 1), lambda b: (0, 0)),
            ],
            out_specs=(
                pl.BlockSpec((1, cv, hw_pad), lambda b: (b, 0, 0)),
                pl.BlockSpec((1, cs, hw_pad), lambda b: (b, 0, 0)),
            ),
        ),
        compiler_params=pltpu.CompilerParams(
            dimension_semantics=("parallel",),   # batch shards across v7x cores
            vmem_limit_bytes=vmem_limit),
        cost_estimate=pl.CostEstimate(
            flops=int(2 * B * (cv + cs) * (hw_pad + 2 * dim_out)),
            transcendentals=int(B * (dim_out + cv + cs)),
            bytes_accessed=int(2 * io_bytes)),
    )(vis3, sk3, w_sq_v, w_sq_s, b_sq, w_gates, b_gates)


# --------------------------------------------------------------------------- #
# Two-pass streaming fallback: reduce(+gates) pass, then modulation pass
# --------------------------------------------------------------------------- #

def _reduce_gate_kernel(vis_ref, sk_ref,
                        w_sq_v_ref, w_sq_s_ref, b_sq_ref, w_gates_ref, b_gates_ref,
                        vgate_ref, sgate_ref,
                        vsum_ref, ssum_ref,
                        *, cv, inv_hw):
    t = pl.program_id(1)

    @pl.when(t == 0)
    def _init():
        vsum_ref[...] = jnp.zeros_like(vsum_ref)
        ssum_ref[...] = jnp.zeros_like(ssum_ref)

    # Steady state is pure vld + vadd: lane-wise partial sums, no per-step XLU.
    vsum_ref[...] += _fold_lanes(vis_ref[...])             # (1, Cv, 128)
    ssum_ref[...] += _fold_lanes(sk_ref[...])              # (1, Cs, 128)

    @pl.when(t == pl.num_programs(1) - 1)
    def _finalize():
        mean_v = jnp.sum(vsum_ref[...][0], axis=-1, keepdims=True) * inv_hw  # (Cv, 1)
        mean_s = jnp.sum(ssum_ref[...][0], axis=-1, keepdims=True) * inv_hw  # (Cs, 1)
        gates = _gate_columns(mean_v, mean_s,
                              w_sq_v_ref[...], w_sq_s_ref[...], b_sq_ref[...],
                              w_gates_ref[...], b_gates_ref[...])            # (Cv+Cs, 1)
        vgate_ref[...] = gates[None, :cv, :]
        sgate_ref[...] = gates[None, cv:, :]


def _modulate_kernel(vis_ref, sk_ref, vgate_ref, sgate_ref, out_vis_ref, out_sk_ref):
    # (1, C, 1) gate blocks broadcast over the lane (HW) axis in-register.
    out_vis_ref[...] = vis_ref[...] * vgate_ref[...]
    out_sk_ref[...] = sk_ref[...] * sgate_ref[...]


def _mmtm_two_pass(vis3, sk3, weights, *, cv, cs, dim_out, inv_hw, tile, n_tiles,
                   vmem_limit):
    B, _, hw_pad = vis3.shape
    w_sq_v, w_sq_s, b_sq, w_gates, b_gates = weights
    io_bytes = 4 * B * (cv + cs) * hw_pad

    # ---- Pass 1: batch-parallel tiled spatial reduction + fused gate math ----
    vgate, sgate = pl.pallas_call(
        functools.partial(_reduce_gate_kernel, cv=cv, inv_hw=inv_hw),
        out_shape=(jax.ShapeDtypeStruct((B, cv, 1), jnp.float32),
                   jax.ShapeDtypeStruct((B, cs, 1), jnp.float32)),
        grid_spec=pltpu.PrefetchScalarGridSpec(
            num_scalar_prefetch=0,
            grid=(B, n_tiles),
            in_specs=[
                pl.BlockSpec((1, cv, tile), lambda b, t: (b, 0, t)),
                pl.BlockSpec((1, cs, tile), lambda b, t: (b, 0, t)),
                pl.BlockSpec((dim_out, cv), lambda b, t: (0, 0)),
                pl.BlockSpec((dim_out, cs), lambda b, t: (0, 0)),
                pl.BlockSpec((dim_out, 1), lambda b, t: (0, 0)),
                pl.BlockSpec((cv + cs, dim_out), lambda b, t: (0, 0)),
                pl.BlockSpec((cv + cs, 1), lambda b, t: (0, 0)),
            ],
            out_specs=(
                pl.BlockSpec((1, cv, 1), lambda b, t: (b, 0, 0)),
                pl.BlockSpec((1, cs, 1), lambda b, t: (b, 0, 0)),
            ),
            scratch_shapes=[
                pltpu.VMEM((1, cv, MIN_LANE_TILE), jnp.float32),
                pltpu.VMEM((1, cs, MIN_LANE_TILE), jnp.float32),
            ],
        ),
        compiler_params=pltpu.CompilerParams(
            dimension_semantics=("parallel", "arbitrary"),
            vmem_limit_bytes=vmem_limit),
        cost_estimate=pl.CostEstimate(
            flops=int(B * (cv + cs) * hw_pad),
            transcendentals=int(B * (dim_out + cv + cs)),
            bytes_accessed=int(io_bytes)),
    )(vis3, sk3, w_sq_v, w_sq_s, b_sq, w_gates, b_gates)

    # ---- Pass 2: fully parallel, lane-dense streaming modulation -------------
    out_vis, out_sk = pl.pallas_call(
        _modulate_kernel,
        out_shape=(jax.ShapeDtypeStruct((B, cv, hw_pad), jnp.float32),
                   jax.ShapeDtypeStruct((B, cs, hw_pad), jnp.float32)),
        grid_spec=pltpu.PrefetchScalarGridSpec(
            num_scalar_prefetch=0,
            grid=(B, n_tiles),
            in_specs=[
                pl.BlockSpec((1, cv, tile), lambda b, t: (b, 0, t)),
                pl.BlockSpec((1, cs, tile), lambda b, t: (b, 0, t)),
                pl.BlockSpec((1, cv, 1), lambda b, t: (b, 0, 0)),
                pl.BlockSpec((1, cs, 1), lambda b, t: (b, 0, 0)),
            ],
            out_specs=(
                pl.BlockSpec((1, cv, tile), lambda b, t: (b, 0, t)),
                pl.BlockSpec((1, cs, tile), lambda b, t: (b, 0, t)),
            ),
        ),
        compiler_params=pltpu.CompilerParams(
            dimension_semantics=("parallel", "parallel"),
            vmem_limit_bytes=vmem_limit),
        cost_estimate=pl.CostEstimate(
            flops=int(B * (cv + cs) * hw_pad),
            transcendentals=0,
            bytes_accessed=int(2 * io_bytes)),
    )(vis3, sk3, vgate, sgate)

    return out_vis, out_sk


# --------------------------------------------------------------------------- #
# Public wrapper
# --------------------------------------------------------------------------- #

def mmtm_forward(visual, skeleton, params, *, force_path=None, max_tile_hw=None,
                 vmem_budget_bytes=None):
    """visual: (B, Cv, H, W), skeleton: (B, Cs, H, W) — NCHW, float32 (B >= 2)."""
    B, cv, H, W = visual.shape
    Bs, cs, Hs, Ws = skeleton.shape
    assert B == Bs and (H, W) == (Hs, Ws)
    hw = H * W
    f32 = jnp.float32

    vis3 = visual.reshape(B, cv, hw).astype(f32)
    sk3 = skeleton.reshape(B, cs, hw).astype(f32)

    # Column-form weights (PyTorch Linear stores (out, in), which is exactly the
    # column form we want): channels / dim_out stay on the sublane axis.
    w_sq = params["w_squeeze"].astype(f32)                           # (dim_out, Cv+Cs)
    w_sq_v, w_sq_s = w_sq[:, :cv], w_sq[:, cv:]
    b_sq = params["b_squeeze"].astype(f32)[:, None]                  # (dim_out, 1)
    w_gates = jnp.concatenate(
        [params["w_visual"], params["w_skeleton"]], axis=0).astype(f32)  # (Cv+Cs, dim_out)
    b_gates = jnp.concatenate(
        [params["b_visual"], params["b_skeleton"]]).astype(f32)[:, None]  # (Cv+Cs, 1)
    weights = (w_sq_v, w_sq_s, b_sq, w_gates, b_gates)
    dim_out = w_sq.shape[0]

    budget, vmem_limit = _vmem_budgets(vmem_budget_bytes)
    weight_bytes = 4 * (w_sq.size + w_gates.size + b_sq.size + b_gates.size)
    # Double-buffered weights + tiny sum/gate scratch.
    fixed_bytes = 2 * weight_bytes + 4 * (cv + cs) * (MIN_LANE_TILE + 2)
    hw_min = _round_up(hw, MIN_LANE_TILE)

    path = force_path
    if path is None:
        # Fused single-read path needs 2 in + 2 out slabs of one batch element
        # (double-buffered across the batch grid axis).
        fused_bytes = 16 * (cv + cs) * hw_min + fixed_bytes
        path = "fused" if fused_bytes <= budget else "twopass"

    if path == "fused":
        tile, n_tiles, hw_pad = hw_min, 1, hw_min
    else:
        # Budget the streamed tile for pass 2 (2 in + 2 out, double-buffered =
        # 16 bytes per (channel, lane)); pass 1 reuses the same (smaller) tile.
        lane_bytes = 16 * (cv + cs)
        target = max(MIN_LANE_TILE, (budget - fixed_bytes) // lane_bytes)
        if max_tile_hw is not None:
            target = min(target, int(max_tile_hw))
        tile, n_tiles, hw_pad = _plan_tiles(hw, target)

    if hw_pad != hw:
        # Zero-pad the spatial axis to keep every tile lane-dense (multiple of
        # 128); zeros are harmless for the sums (we divide by the true hw) and
        # the padded output lanes are sliced away below.
        pad = ((0, 0), (0, 0), (0, hw_pad - hw))
        vis3 = jnp.pad(vis3, pad)
        sk3 = jnp.pad(sk3, pad)

    inv_hw = 1.0 / float(hw)

    if path == "fused":
        out_vis, out_sk = _mmtm_fused(vis3, sk3, weights, cv=cv, cs=cs,
                                      dim_out=dim_out, inv_hw=inv_hw,
                                      vmem_limit=vmem_limit)
    else:
        out_vis, out_sk = _mmtm_two_pass(vis3, sk3, weights, cv=cv, cs=cs,
                                         dim_out=dim_out, inv_hw=inv_hw,
                                         tile=tile, n_tiles=n_tiles,
                                         vmem_limit=vmem_limit)

    out_vis = out_vis[:, :, :hw].reshape(B, cv, H, W)
    out_sk = out_sk[:, :, :hw].reshape(B, cs, H, W)
    return out_vis, out_sk


# --------------------------------------------------------------------------- #
# Reference + synthetic params + self-test
# --------------------------------------------------------------------------- #

def init_mmtm_params(dim_visual, dim_skeleton, ratio, key):
    dim = dim_visual + dim_skeleton
    dim_out = int(2 * dim / ratio)
    k = jax.random.split(key, 6)
    # PyTorch Linear weight layout: (out_features, in_features).
    return {
        "w_squeeze": jax.random.normal(k[0], (dim_out, dim), jnp.float32) * 0.1,
        "b_squeeze": jax.random.normal(k[1], (dim_out,), jnp.float32) * 0.1,
        "w_visual": jax.random.normal(k[2], (dim_visual, dim_out), jnp.float32) * 0.1,
        "b_visual": jax.random.normal(k[3], (dim_visual,), jnp.float32) * 0.1,
        "w_skeleton": jax.random.normal(k[4], (dim_skeleton, dim_out), jnp.float32) * 0.1,
        "b_skeleton": jax.random.normal(k[5], (dim_skeleton,), jnp.float32) * 0.1,
    }


def mmtm_reference(visual, skeleton, params):
    """Pure-JAX reference mirroring the PyTorch forward exactly (B > 1)."""
    squeeze = jnp.concatenate([visual, skeleton], axis=1)
    squeeze = jnp.mean(squeeze, axis=(2, 3))
    exc = jnp.maximum(squeeze @ params["w_squeeze"].T + params["b_squeeze"], 0.0)
    vis_out = jax.nn.sigmoid(exc @ params["w_visual"].T + params["b_visual"])
    sk_out = jax.nn.sigmoid(exc @ params["w_skeleton"].T + params["b_skeleton"])
    return (visual * vis_out[:, :, None, None],
            skeleton * sk_out[:, :, None, None])


if __name__ == "__main__":
    key = jax.random.PRNGKey(0)
    keys = jax.random.split(key, 3)

    def run_case(k, B, cv, cs, H, W, ratio, **kw):
        kv, ks, kp = jax.random.split(k, 3)
        visual = jax.random.normal(kv, (B, cv, H, W), jnp.float32)
        skeleton = jax.random.normal(ks, (B, cs, H, W), jnp.float32)
        params = init_mmtm_params(cv, cs, ratio, kp)
        out_vis, out_sk = mmtm_forward(visual, skeleton, params, **kw)
        jax.block_until_ready((out_vis, out_sk))
        ref_vis, ref_sk = mmtm_reference(visual, skeleton, params)
        assert out_vis.shape == ref_vis.shape and out_sk.shape == ref_sk.shape
        assert jnp.allclose(out_vis, ref_vis, atol=1e-5, rtol=1e-5)
        assert jnp.allclose(out_sk, ref_sk, atol=1e-5, rtol=1e-5)

    # 1) Small, 128-aligned spatial -> fused single-read path.
    run_case(keys[0], B=2, cv=4, cs=4, H=16, W=16, ratio=4)
    # 2) Non-128-aligned spatial + asymmetric channels -> fused path with padding.
    run_case(keys[1], B=2, cv=8, cs=4, H=20, W=20, ratio=4)
    # 3) Streaming two-pass (reduce -> modulate) fallback with several HW tiles.
    run_case(keys[2], B=2, cv=8, cs=4, H=20, W=20, ratio=4,
             force_path="twopass", max_tile_hw=128)

    print("KERNEL_OK")
</pallas_src>

<mosaic_0001>
module attributes {stable_mosaic.version = 11 : i64} {
  func.func @_fused_kernel(%arg0: i32, %arg1: memref<1x4x256xf32, #tpu.memory_space<vmem>>, %arg2: memref<1x4x256xf32, #tpu.memory_space<vmem>>, %arg3: memref<4x4xf32, #tpu.memory_space<vmem>>, %arg4: memref<4x4xf32, #tpu.memory_space<vmem>>, %arg5: memref<4x1xf32, #tpu.memory_space<vmem>>, %arg6: memref<8x4xf32, #tpu.memory_space<vmem>>, %arg7: memref<8x1xf32, #tpu.memory_space<vmem>>, %arg8: memref<1x4x256xf32, #tpu.memory_space<vmem>>, %arg9: memref<1x4x256xf32, #tpu.memory_space<vmem>>) attributes {dimension_semantics = [#tpu.dimension_semantics<parallel>], iteration_bounds = array<i64: 2>, scalar_prefetch = 0 : i64, scratch_operands = 0 : i64, tpu.core_type = #tpu.core_type<tc>, window_params = [{transform_indices = @transform_0, window_bounds = array<i64: 1, 4, 256>}, {transform_indices = @transform_1, window_bounds = array<i64: 1, 4, 256>}, {pipeline_mode = #tpu.pipeline_mode<synchronous>, transform_indices = @transform_2, window_bounds = array<i64: 4, 4>}, {pipeline_mode = #tpu.pipeline_mode<synchronous>, transform_indices = @transform_3, window_bounds = array<i64: 4, 4>}, {pipeline_mode = #tpu.pipeline_mode<synchronous>, transform_indices = @transform_4, window_bounds = array<i64: 4, 1>}, {pipeline_mode = #tpu.pipeline_mode<synchronous>, transform_indices = @transform_5, window_bounds = array<i64: 8, 4>}, {pipeline_mode = #tpu.pipeline_mode<synchronous>, transform_indices = @transform_6, window_bounds = array<i64: 8, 1>}, {transform_indices = @transform_7, window_bounds = array<i64: 1, 4, 256>}, {transform_indices = @transform_8, window_bounds = array<i64: 1, 4, 256>}]} {
    %c0 = arith.constant 0 : index
    %c0_0 = arith.constant 0 : index
    %c0_1 = arith.constant 0 : index
    %0 = vector.load %arg1[%c0, %c0_0, %c0_1] : memref<1x4x256xf32, #tpu.memory_space<vmem>>, vector<1x4x256xf32>
    %c0_2 = arith.constant 0 : index
    %c0_3 = arith.constant 0 : index
    %c0_4 = arith.constant 0 : index
    %1 = vector.load %arg2[%c0_2, %c0_3, %c0_4] : memref<1x4x256xf32, #tpu.memory_space<vmem>>, vector<1x4x256xf32>
    %2 = vector.extract_strided_slice %0 {offsets = [0, 0, 0], sizes = [1, 4, 128], strides = [1, 1, 1]} : vector<1x4x256xf32> to vector<1x4x128xf32>
    %3 = vector.extract_strided_slice %0 {offsets = [0, 0, 128], sizes = [1, 4, 128], strides = [1, 1, 1]} : vector<1x4x256xf32> to vector<1x4x128xf32>
    %4 = arith.addf %2, %3 : vector<1x4x128xf32>
    %5 = vector.shape_cast %4 : vector<1x4x128xf32> to vector<4x128xf32>
    %cst = arith.constant dense<0.000000e+00> : vector<4xf32>
    %6 = vector.multi_reduction <add>, %5, %cst [1] : vector<4x128xf32> to vector<4xf32>
    %7 = vector.shape_cast %6 : vector<4xf32> to vector<4x1xf32>
    %cst_5 = arith.constant 3.906250e-03 : f32
    %8 = vector.broadcast %cst_5 : f32 to vector<4x1xf32>
    %9 = arith.mulf %7, %8 : vector<4x1xf32>
    %10 = vector.extract_strided_slice %1 {offsets = [0, 0, 0], sizes = [1, 4, 128], strides = [1, 1, 1]} : vector<1x4x256xf32> to vector<1x4x128xf32>
    %11 = vector.extract_strided_slice %1 {offsets = [0, 0, 128], sizes = [1, 4, 128], strides = [1, 1, 1]} : vector<1x4x256xf32> to vector<1x4x128xf32>
    %12 = arith.addf %10, %11 : vector<1x4x128xf32>
    %13 = vector.shape_cast %12 : vector<1x4x128xf32> to vector<4x128xf32>
    %cst_6 = arith.constant dense<0.000000e+00> : vector<4xf32>
    %14 = vector.multi_reduction <add>, %13, %cst_6 [1] : vector<4x128xf32> to vector<4xf32>
    %15 = vector.shape_cast %14 : vector<4xf32> to vector<4x1xf32>
    %cst_7 = arith.constant 3.906250e-03 : f32
    %16 = vector.broadcast %cst_7 : f32 to vector<4x1xf32>
    %17 = arith.mulf %15, %16 : vector<4x1xf32>
    %c0_8 = arith.constant 0 : index
    %c0_9 = arith.constant 0 : index
    %18 = vector.load %arg3[%c0_8, %c0_9] : memref<4x4xf32, #tpu.memory_space<vmem>>, vector<4x4xf32>
    %c0_10 = arith.constant 0 : index
    %c0_11 = arith.constant 0 : index
    %19 = vector.load %arg4[%c0_10, %c0_11] : memref<4x4xf32, #tpu.memory_space<vmem>>, vector<4x4xf32>
    %c0_12 = arith.constant 0 : index
    %c0_13 = arith.constant 0 : index
    %20 = vector.load %arg5[%c0_12, %c0_13] : memref<4x1xf32, #tpu.memory_space<vmem>>, vector<4x1xf32>
    %c0_14 = arith.constant 0 : index
    %c0_15 = arith.constant 0 : index
    %21 = vector.load %arg6[%c0_14, %c0_15] : memref<8x4xf32, #tpu.memory_space<vmem>>, vector<8x4xf32>
    %c0_16 = arith.constant 0 : index
    %c0_17 = arith.constant 0 : index
    %22 = vector.load %arg7[%c0_16, %c0_17] : memref<8x1xf32, #tpu.memory_space<vmem>>, vector<8x1xf32>
    %cst_18 = arith.constant dense<0.000000e+00> : vector<4x1xf32>
    %23 = tpu.matmul %18, %9, %cst_18 {dimension_numbers = #tpu.dot_dimension_numbers<[1], [0], [0], [1], [0, 0, 1, 1], [], []>} : vector<4x4xf32>, vector<4x1xf32>, vector<4x1xf32> -> vector<4x1xf32>
    %cst_19 = arith.constant dense<0.000000e+00> : vector<4x1xf32>
    %24 = tpu.matmul %19, %17, %cst_19 {dimension_numbers = #tpu.dot_dimension_numbers<[1], [0], [0], [1], [0, 0, 1, 1], [], []>} : vector<4x4xf32>, vector<4x1xf32>, vector<4x1xf32> -> vector<4x1xf32>
    %25 = arith.addf %23, %24 : vector<4x1xf32>
    %26 = arith.addf %25, %20 : vector<4x1xf32>
    %cst_20 = arith.constant 0.000000e+00 : f32
    %27 = vector.broadcast %cst_20 : f32 to vector<4x1xf32>
    %28 = arith.maximumf %26, %27 : vector<4x1xf32>
    %cst_21 = arith.constant dense<0.000000e+00> : vector<8x1xf32>
    %29 = tpu.matmul %21, %28, %cst_21 {dimension_numbers = #tpu.dot_dimension_numbers<[1], [0], [0], [1], [0, 0, 1, 1], [], []>} : vector<8x4xf32>, vector<4x1xf32>, vector<8x1xf32> -> vector<8x1xf32>
    %30 = arith.addf %29, %22 : vector<8x1xf32>
    %31 = arith.negf %30 : vector<8x1xf32>
    %32 = math.exp %31 : vector<8x1xf32>
    %cst_22 = arith.constant 1.000000e+00 : f32
    %33 = vector.broadcast %cst_22 : f32 to vector<8x1xf32>
    %34 = arith.addf %33, %32 : vector<8x1xf32>
    %35 = arith.divf %33, %34 : vector<8x1xf32>
    %36 = vector.extract_strided_slice %35 {offsets = [0, 0], sizes = [4, 1], strides = [1, 1]} : vector<8x1xf32> to vector<4x1xf32>
    %37 = vector.shape_cast %36 : vector<4x1xf32> to vector<1x4x1xf32>
    %38 = vector.broadcast %37 : vector<1x4x1xf32> to vector<1x4x256xf32>
    %39 = arith.mulf %0, %38 : vector<1x4x256xf32>
    %c0_23 = arith.constant 0 : index
    %c0_24 = arith.constant 0 : index
    %c0_25 = arith.constant 0 : index
    %40 = vector.load %arg8[%c0_23, %c0_24, %c0_25] : memref<1x4x256xf32, #tpu.memory_space<vmem>>, vector<1x4x256xf32>
    tpu.vector_store %arg8[%c0_23, %c0_24, %c0_25], %39 {strides = array<i32>} : memref<1x4x256xf32, #tpu.memory_space<vmem>>, vector<1x4x256xf32>,
    %41 = vector.extract_strided_slice %35 {offsets = [4, 0], sizes = [4, 1], strides = [1, 1]} : vector<8x1xf32> to vector<4x1xf32>
    %42 = vector.shape_cast %41 : vector<4x1xf32> to vector<1x4x1xf32>
    %43 = vector.broadcast %42 : vector<1x4x1xf32> to vector<1x4x256xf32>
    %44 = arith.mulf %1, %43 : vector<1x4x256xf32>
    %c0_26 = arith.constant 0 : index
    %c0_27 = arith.constant 0 : index
    %c0_28 = arith.constant 0 : index
    %45 = vector.load %arg9[%c0_26, %c0_27, %c0_28] : memref<1x4x256xf32, #tpu.memory_space<vmem>>, vector<1x4x256xf32>
    tpu.vector_store %arg9[%c0_26, %c0_27, %c0_28], %44 {strides = array<i32>} : memref<1x4x256xf32, #tpu.memory_space<vmem>>, vector<1x4x256xf32>,
    return
  }
  func.func @transform_0(%arg0: i32) -> (i32, i32, i32) {
    %c0_i32 = arith.constant 0 : i32
    %c0_i32_0 = arith.constant 0 : i32
    %c0_i32_1 = arith.constant 0 : i32
    return %arg0, %c0_i32, %c0_i32_0 : i32, i32, i32
  }
  func.func @transform_1(%arg0: i32) -> (i32, i32, i32) {
    %c0_i32 = arith.constant 0 : i32
    %c0_i32_0 = arith.constant 0 : i32
    %c0_i32_1 = arith.constant 0 : i32
    return %arg0, %c0_i32, %c0_i32_0 : i32, i32, i32
  }
  func.func @transform_2(%arg0: i32) -> (i32, i32) {
    %c0_i32 = arith.constant 0 : i32
    %c0_i32_0 = arith.constant 0 : i32
    %c0_i32_1 = arith.constant 0 : i32
    return %c0_i32, %c0_i32_0 : i32, i32
  }
  func.func @transform_3(%arg0: i32) -> (i32, i32) {
    %c0_i32 = arith.constant 0 : i32
    %c0_i32_0 = arith.constant 0 : i32
    %c0_i32_1 = arith.constant 0 : i32
    return %c0_i32, %c0_i32_0 : i32, i32
  }
  func.func @transform_4(%arg0: i32) -> (i32, i32) {
    %c0_i32 = arith.constant 0 : i32
    %c0_i32_0 = arith.constant 0 : i32
    %c0_i32_1 = arith.constant 0 : i32
    return %c0_i32, %c0_i32_0 : i32, i32
  }
  func.func @transform_5(%arg0: i32) -> (i32, i32) {
    %c0_i32 = arith.constant 0 : i32
    %c0_i32_0 = arith.constant 0 : i32
    %c0_i32_1 = arith.constant 0 : i32
    return %c0_i32, %c0_i32_0 : i32, i32
  }
  func.func @transform_6(%arg0: i32) -> (i32, i32) {
    %c0_i32 = arith.constant 0 : i32
    %c0_i32_0 = arith.constant 0 : i32
    %c0_i32_1 = arith.constant 0 : i32
    return %c0_i32, %c0_i32_0 : i32, i32
  }
  func.func @transform_7(%arg0: i32) -> (i32, i32, i32) {
    %c0_i32 = arith.constant 0 : i32
    %c0_i32_0 = arith.constant 0 : i32
    %c0_i32_1 = arith.constant 0 : i32
    return %arg0, %c0_i32, %c0_i32_0 : i32, i32, i32
  }
  func.func @transform_8(%arg0: i32) -> (i32, i32, i32) {
    %c0_i32 = arith.constant 0 : i32
    %c0_i32_0 = arith.constant 0 : i32
    %c0_i32_1 = arith.constant 0 : i32
    return %arg0, %c0_i32, %c0_i32_0 : i32, i32, i32
  }
}

</mosaic_0001>

<bundles_post_ra>
// kernel: tpu_custom_call.1
= control target key start
LH: loop header
LB: loop body
LE: loop exit
PB: predicated region body
PF: predicated region fallthrough
CT: control target
= control target key end

     0   :  { %14 = vsyncpa [#allocation3], 0  ;;  %s1114_s0 = inlined_call_operand.vmem [shape: f32[2,4,256], index: 0, kind: input, shape index: {}]   ;;  %s1115_s1 = inlined_call_operand.hbm [shape: f32[2,4,256], index: 1, kind: input, shape index: {}]   ;;  %s1116_s2 = inlined_call_operand.vmem [shape: f32[4,4], index: 2, kind: input, shape index: {}]   ;;  %s1117_s3 = inlined_call_operand.vmem [shape: f32[4,4], index: 3, kind: input, shape index: {}]   ;;  %s1118_s4 = inlined_call_operand.vmem [shape: f32[4,1], index: 4, kind: input, shape index: {}]   ;;  %s1119_s5 = inlined_call_operand.vmem [shape: f32[8,4], index: 5, kind: input, shape index: {}]   ;;  %s1120_s6 = inlined_call_operand.vmem [shape: f32[8,1], index: 6, kind: input, shape index: {}]   ;;  %s1121_s7 = inlined_call_operand.hbm [shape: f32[2,4,256], index: 7, kind: output, shape index: {0}]   ;;  %s1122_s8 = inlined_call_operand.hbm [shape: f32[2,4,256], index: 8, kind: output, shape index: {1}]  }
   0x1   :  { %16 = vsyncpa [#allocation3 + $0x1], 0 }
   0x2   :  { %17 = vsyncpa [#allocation4], 0 }
   0x3   :  { %19 = vsyncpa [#allocation4 + $0x1], 0 }
   0x4   :  { %20 = vsyncpa [#allocation7], 0 }
   0x5   :  { %22 = vsyncpa [#allocation7 + $0x1], 0  ;;  %s918_s27 = smov 0   ;;  %s920_s28 = smov 0  }
   0x6   :  { %s922_s29 = smov 0   ;;  %s924_s30 = smov 0  }
   0x7 LB: > { %1124 = sst [smem:[#allocation11_spill]] %s864_s29  ;;  %s939_s9 = sadd.s32 4294967295, %s868_s30   ;;  %s868_s30 = sphi %s924_s30, %s1136_s30   ;;  %s864_s29 = sphi %s922_s29, %s1133_s29   ;;  %s860_s28 = sphi %s920_s28, %s1135_s28   ;;  %s856_s27 = sphi %s918_s27, %s1134_s27  }
   0x8   : > { %s649_s10 = sadd.s32 4294967294, %s868_s30   ;;  %s943_s11 = sadd.s32 1, %s868_s30  }
   0x9   : > { %s61_s12 = sadd.s32 1, %s864_s29  ;;  %s58_s13 = ssub.s32 %s868_s30, %s943_s11 }
   0xa   : > { %p68_p0 = scmp.ne.s32.totalorder %s864_s29, %s860_s28  ;;  %p59_p1 = scmp.eq.s32.totalorder %s58_s13, 0 }
   0xb   : > { %p69_p2 = scmp.eq.s32.totalorder %s868_s30, 0  ;;  %p74_p3 = scmp.ne.s32.totalorder %s860_s28, %s856_s27 }
   0xc   : > { %p75_p4 = scmp.eq.s32.totalorder %s939_s9, 0  ;;  %p203_p7 = scmp.eq.s32.totalorder %s939_s9, 1 }
   0xd   : > { %s955_s14 = scalar_select %p59_p1, %s864_s29, %s61_s12  }
   0xe   : > { %p957_p5 = por %p69_p2, %p68_p0  ;;  %p961_p6 = por %p75_p4, %p74_p3 }
   0xf   : > { %1125 = sst [smem:[#allocation12_spill]] %s955_s14  ;;  %p209_p8 = scmp.eq.s32.totalorder %s649_s10, 1 }
  0x10   : > { %p697_p10 = scmp.lt.s32.totalorder %s868_s30, 2  ;;  %p968_p11 = por %p203_p7, %p68_p0 }
  0x11   : > { %p972_p12 = por %p209_p8, %p74_p3  ;;  %s278_s19 = sand.u32 1, %s864_s29  }
  0x12   : > { %s676_s20 = sshll.u32 %s868_s30, 3  ;;  %s652_s21 = sshll.u32 %s278_s19, 3 }
  0x13   : > { %s287_s24 = scalar_lea.hbm %s1115_s1, %s676_s20  ;;  %s282_s26 = scalar_lea.vmem [#allocation2], %s652_s21 }
  0x14   : > { %s289_s25 = sshll.u32 %s287_s24, 4  ;;  %s291_s10 = sshll.u32 %s282_s26, 4  ;;  %s290_s25 = int_to_ptr.hbm [resolvable:$true] %s289_s25  ;;  %s292_s10 = int_to_ptr.vmem [resolvable:$true] %s291_s10 }
  0x15   : > { %p983_p13 = pnand %p697_p10, %p957_p5  ;;  %p655_p0 = scmp.ge.s32.totalorder %s868_s30, 1 }
  0x16   : > { %p296_p1 = scmp.lt.s32.totalorder %s868_s30, 3  ;;  %s279_s13 = scalar_lea.sflag [#allocation3], %s278_s19 }
  0x17   : > { %s740_s14 = sshra.s32 %s290_s25, 4  ;;  %p744_p3 = pneg %p983_p13  ;;  %s741_s14 = int_to_ptr.hbm [resolvable:$true] %s740_s14 }
  0x18   : > { %s742_s29 = scalar_lea.hbm %s741_s14, 8  ;;  %s747_s15 = scalar_lea.hbm %s1115_s1, 16 }
  0x19   : > { %p743_p2 = scmp.ne.s32.totalorder %s741_s14, %s742_s29  ;;  %p748_p5 = scmp.lt.s32.totalorder %s741_s14, %s1115_s1 }
  0x1a   : > { %p749_p8 = scmp.lt.s32.totalorder %s747_s15, %s742_s29 }
  0x1b   : > { %p745_p4 = pnand %p744_p3, %p743_p2 }
  0x1c   : > { %p750_p10 = por %p749_p8, %p748_p5 }
  0x1d   : > { %p746_p7 = pneg %p745_p4 }
  0x1f   : > { %p751_p9 = pnand %p750_p10, %p746_p7 }
  0x21   : > { %754 = shalt.err (!%p751_p9)
}
  0x22   : > { %689 = dma.hbm_to_vmem [thread:$0]  (!%p983_p13), %s290_s25, 128, %s292_s10, %s279_s13  }
  0x23   : > { %p297_p2 = pnand %p655_p0, %p296_p1 }
  0x24   : > { %s1004_s19 = sand.u32 (!%p297_p2), 1, %s860_s28  }
  0x25   : > { %300 = sbr.rel (%p297_p2) target bundleno = 611 (0x263), region = 48  ;;  %s1007_s14 = sshll.u32 (!%p297_p2), %s1004_s19, 3 }
  0x26   : > { %s303_s29 = scalar_lea.sflag (!%p297_p2), [#allocation3], %s1004_s19  ;;  %s306_s24 = scalar_lea.vmem (!%p297_p2), [#allocation2], %s1007_s14 }
  0x2a   : > { %843 = dma.done.wait (%p961_p6), %s303_s29, 128  }
  0x2b   : > { %845 = vsyncadd (%p961_p6), %s303_s29, 4294967168  ;;  %p350_p9 = scmp.lt.s32.totalorder %s939_s9, 1  ;;  %v1022_v1 = vld [vmem:[%s306_s24] sm:$0xff]  ;;  %vm361_vm0 = vcmask 1043456   ;;  %vm379_vm1 = vcmask 31744   ;;  %v870_v21 = vmov 0  }
  0x2c   : > { %v367_v4 = vrot.slane %v1022_v1, 4  ;;  %v374_v10 = vld [vmem:[%s1116_s2] sm:$0xf]  ;;  %734 = vset.pattern.permute.xlu1 %v870_v21  ;;  %735 = vset.pattern.permute.xlu0 %v870_v21  ;;  %v871_v38 = vmov 839922192   ;;  %s678_s10 = sshll.u32 %s939_s9, 3 }
  0x2d   : > { %s351_s25 = scalar_select %p350_p9, %s939_s9, 1  ;;  %v375_v13 = vld [vmem:[%s1117_s3] sm:$0xf]  ;;  %v484_v39 = vunpack.c.l.s4 %v871_v38  ;;  %v872_v40 = vmov 1985246804  }
  0x2e   : > { %v369_v6 = vadd.f32 %v367_v4, %v1022_v1  ;;  %v376_v16 = vld [vmem:[%s1118_s4] sm:$0xf]  ;;  %v491_v41 = vunpack.c.l.s4 %v872_v40  ;;  %s514_s16 = scalar_lea.hbm %s1121_s7, %s678_s10  ;;  %s529_s15 = scalar_lea.hbm %s1122_s8, %s678_s10 }
  0x2f   : > { %s677_s26 = sshll.u32 %s351_s25, 3  ;;  %v377_v20 = vld [vmem:[%s1119_s5] sm:$0xff]  ;;  %v485_v42 = vunpack.c.0.s8 %v484_v39  ;;  %s342_s22 = scalar_lea.vmem [#allocation5], %s1007_s14 }
  0x30   : > { %s354_s13 = scalar_lea.vmem %s1114_s0, %s677_s26  ;;  %v370_v7 = vsel %vm361_vm0, %v369_v6, 0.0  ;;  %v378_v22 = vld [vmem:[%s1120_s6] sm:$0xff]  ;;  %v492_v43 = vunpack.c.0.s8 %v491_v41  ;;  %s1059_s23 = sshll.u32 %s342_s22, 4  ;;  %s517_s23 = int_to_ptr.vmem [resolvable:$true] %s1059_s23 }
  0x31   : > { %v1020_v0 = vld [vmem:[%s354_s13] sm:$0xff]  ;;  %s518_s29 = sshll.u32 %s514_s16, 4  ;;  %s349_s9 = scalar_lea.vmem [#allocation6], %s1007_s14  ;;  %s519_s29 = int_to_ptr.hbm [resolvable:$true] %s518_s29 }
  0x32   : > { %v358_v2 = vrot.slane %v1020_v0, 4  ;;  %s1062_s24 = sshll.u32 %s349_s9, 4  ;;  %s533_s25 = sshll.u32 %s529_s15, 4  ;;  %s532_s24 = int_to_ptr.vmem [resolvable:$true] %s1062_s24  ;;  %s1068_s25 = int_to_ptr.hbm [resolvable:$true] %s533_s25 }
  0x33   : > { %s498_s26 = scalar_lea.sflag [#allocation4], %s1004_s19  ;;  %s784_s10 = sshra.s32 %s519_s29, 4  ;;  %s785_s10 = int_to_ptr.hbm [resolvable:$true] %s784_s10 }
  0x34   : > { %v360_v3 = vadd.f32 %v358_v2, %v1020_v0  ;;  %s786_s12 = scalar_lea.hbm %s785_s10, 8  ;;  %s790_s16 = scalar_lea.hbm %s1121_s7, 16 }
  0x35   : > { %p787_p6 = scmp.ne.s32.totalorder %s785_s10, %s786_s12  ;;  %p791_p1 = scmp.lt.s32.totalorder %s785_s10, %s1121_s7 }
  0x36   : > { %v362_v5 = vsel %vm361_vm0, %v360_v3, 0.0  ;;  %p792_p3 = scmp.lt.s32.totalorder %s790_s16, %s786_s12 }
  0x37   : > { %363 = vadd.xlane.f32.xlu0 %v362_v5  ;;  %p788_p13 = pnand %p787_p6, %p968_p11 }
  0x38   : > { %p793_p4 = por %p792_p3, %p791_p1 }
  0x39   : > { %p789_p0 = pneg %p788_p13 }
  0x3b   : > { %p794_p7 = pnand %p793_p4, %p789_p0 }
  0x3f   : > { %371 = vadd.xlane.f32.xlu0 %v370_v7 }
  0xaa   : > { %v364_v8 = vpop.xlane.xlu0 %363 }
  0xab   : > { %v365_v9 = vmul.f32 0.00390625, %v364_v8 }
  0xad   : > { %663 = vmatpush.msk.msra.mxu1 %vm361_vm0, %v365_v9 }
  0xae   : > { %664 = vmatmul.msk.f32.vlgmr.msra.gmra.mxu1 %vm379_vm1, %v374_v10 }
  0xb2   : > { %v372_v11 = vpop.xlane.xlu0 %371 }
  0xb3   : > { %v373_v12 = vmul.f32 0.00390625, %v372_v11 }
  0xb5   : > { %661 = vmatpush.msk.msra.mxu0 %vm361_vm0, %v373_v12 }
  0xb6   : > { %662 = vmatmul.msk.f32.vlgmr.msra.gmra.mxu0 %vm379_vm1, %v375_v13 }
 0x12b   : > { %v429_v14 = vpop.f32.mrf.mxu1 }
 0x133   : > { %v403_v15 = vpop.f32.mrf.mxu0 }
 0x134   : > { %v430_v17 = vadd.f32 %v429_v14, %v403_v15 }
 0x136   : > { %v432_v18 = vadd.f32 %v430_v17, %v376_v16 }
 0x138   : > { %v433_v19 = vmax.f32 %v432_v18, 0.0 }
 0x13a   : > { %665 = vmatpush.msk.msra.mxu2 %vm361_vm0, %v433_v19 }
 0x13b   : > { %666 = vmatmul.msk.f32.vlgmr.msra.gmra.mxu2 %vm379_vm1, %v377_v20 }
 0x1be   : > { %v457_v23 = vpop.f32.mrf.mxu2 }
 0x1bf   : > { %v458_v24 = vadd.f32 %v457_v23, %v378_v22 }
 0x1c1   : > { %v667_v25 = vmul.f32 -1.442695, %v458_v24 }
 0x1c3   : > { %736 = vpow2.f32 %v667_v25 }
 0x1c9   : > { %v737_v26 = vpop.eup %736 }
 0x1ca   : > { %v463_v27 = vadd.f32 1.0, %v737_v26 }
 0x1cc   : > { %738 = vrcp.f32 %v463_v27  ;;  %v475_v31 = vand.u32 2147483648, %v463_v27  ;;  %v473_v33 = vand.u32 2147483647, %v463_v27  ;;  %vm469_vm3 = vweird.f32 %v463_v27 }
 0x1ce   : > { %v476_v35 = vor.u32 1.1754944e-38, %v475_v31  ;;  %vm474_vm5 = vcmp.eq.f32.partialorder %v473_v33, 8.507059e+37 }
 0x1d2   : > { %v739_v28 = vpop.eup %738 }
 0x1d3   : > { %v465_v29 = vmul.f32 %v739_v28, %v463_v27  ;;  %vm470_vm2 = vweird.f32 %v739_v28 }
 0x1d4   : > { %vm471_vm4 = vmor %vm469_vm3, %vm470_vm2 }
 0x1d5   : > { %v466_v30 = vsub.f32 1.0, %v465_v29 }
 0x1d7   : > { %v467_v32 = vmul.f32 %v739_v28, %v466_v30 }
 0x1d9   : > { %v468_v34 = vadd.f32 %v739_v28, %v467_v32 }
 0x1db   : > { %v472_v36 = vsel %vm471_vm4, %v739_v28, %v468_v34 }
 0x1dc   : > { %v477_v37 = vsel %vm474_vm5, %v476_v35, %v472_v36 }
 0x1dd   : > { %481 = vperm.xlu1 %734, %v477_v37  }
 0x24f   : > { %v482_v44 = vpop.permute.xlu1 %481 }
 0x250   : > { %v486_v45 = vperm.slane %v482_v44, %v485_v42  ;;  %v493_v46 = vperm.slane %v482_v44, %v492_v43 }
 0x252   : > { %v488_v47 = vmul.f32 %v486_v45, %v1020_v0  ;;  %v495_v48 = vmul.f32 %v493_v46, %v1022_v1 }
 0x254   : > { %489 = vst [vmem:[%s342_s22] sm:$0xff] %v488_v47 }
 0x255   : > { %797 = shalt.err (!%p794_p7)
}
 0x256   : > { %682 = dma.vmem_to_hbm [thread:$0]  (%p968_p11), %s517_s23, 128, %s519_s29, %s498_s26   ;;  %496 = vst [vmem:[%s349_s9] sm:$0xff] %v495_v48 }
 0x257   : > { %s503_s15 = scalar_lea.sflag [#allocation7], %s1004_s19  ;;  %s812_s22 = sshra.s32 %s1068_s25, 4  ;;  %s813_s22 = int_to_ptr.hbm [resolvable:$true] %s812_s22 }
 0x258   : > { %s814_s14 = scalar_lea.hbm %s813_s22, 8  ;;  %s818_s13 = scalar_lea.hbm %s1122_s8, 16 }
 0x259   : > { %p815_p5 = scmp.ne.s32.totalorder %s813_s22, %s814_s14  ;;  %p819_p2 = scmp.lt.s32.totalorder %s813_s22, %s1122_s8 }
 0x25a   : > { %p820_p9 = scmp.lt.s32.totalorder %s818_s13, %s814_s14 }
 0x25b   : > { %p816_p8 = pnand %p815_p5, %p968_p11 }
 0x25c   : > { %p821_p6 = por %p820_p9, %p819_p2 }
 0x25d   : > { %p817_p10 = pneg %p816_p8 }
 0x25f   : > { %p822_p13 = pnand %p821_p6, %p817_p10 }
 0x261   : > { %825 = shalt.err (!%p822_p13)
}
 0x262   : > { %683 = dma.vmem_to_hbm [thread:$0]  (%p968_p11), %s532_s24, 128, %s1068_s25, %s503_s15  }
 0x263 PF: > { %s545_s19 = sand.u32 1, %s856_s27   ;;  %p1131_p0 = scmp.ge.s32.totalorder %s868_s30, 2 }
 0x264   : > { %s546_s23 = scalar_lea.sflag [#allocation4], %s545_s19 }
 0x265   : > { %p691_p1 = pnand %p1131_p0, %p972_p12 }
 0x267   : > { %p692_p3 = pneg %p691_p1 }
 0x269   : > { %847 = dma.done.wait (%p692_p3), %s546_s23, 128  }
 0x26a   : > { %849 = vsyncadd (%p692_p3), %s546_s23, 4294967168  ;;  %s556_s29 = scalar_lea.sflag [#allocation7], %s545_s19 }
 0x26b   : > { %851 = dma.done.wait (%p692_p3), %s556_s29, 128  }
 0x26c   : > { %853 = vsyncadd (%p692_p3), %s556_s29, 4294967168  ;;  %s1132_s17 = sld [smem:[#allocation11_spill]]  ;;  %p25_p11 = scmp.ge.s32.totalorder %s943_s11, 4  }
 0x26d   : > { %s1133_s29 = sld [smem:[#allocation12_spill]]  ;;  %s1134_s27 = smov %s860_s28 }
 0x26e   : > { %s1136_s30 = smov %s943_s11  ;;  %27 = sbr.rel (!%p25_p11) target bundleno = 7 (0x7), region = 113 }
 0x272   : > { %s1135_s28 = smov %s1132_s17 }
 0x273   :  { %562 = vsyncpa [#allocation3], 1 }
 0x274   :  { %564 = vsyncpa [#allocation3 + $0x1], 1 }
 0x275   :  { %565 = vsyncpa [#allocation4], 1 }
 0x276   :  { %567 = vsyncpa [#allocation4 + $0x1], 1 }
 0x277   :  { %568 = vsyncpa [#allocation7], 1 }
 0x278   :  { %570 = vsyncpa [#allocation7 + $0x1], 1 }

</bundles_post_ra>
